<compile_context>
chip_gen: v6e
topology: v6e:2x2x1
jax: 0.10.0
libtpu: 0.0.40
codegen_flags: <defaults>
</compile_context>

<pallas_src>
import functools

import jax
import jax.numpy as jnp
from jax.experimental import pallas as pl
from jax.experimental.pallas import tpu as pltpu

_VMEM_LIMIT_BYTES = 32 * 1024 * 1024      # safe on v5e (128 MiB), v6e (128), v7x (64)
_TILE_BUDGET_BYTES = 12 * 1024 * 1024     # budget for double-buffered block slabs
_FUSED_BUDGET_BYTES = 20 * 1024 * 1024    # budget for the single-pass per-batch slab
_MAX_SPATIAL_TILE = 2048                  # mem-bound roofline plateaus ~512-2048 rows


# ---------------------------------------------------------------------------
# Fused single-pass kernel: grid = (B,), block = (1, Sp, Cp).
# Reads x once, computes max/sum pools, folds the k lane-groups with
# pltpu.roll, runs the (pre-folded-weight) MLP, and applies the sigmoid gate.
# ---------------------------------------------------------------------------
def _fused_kernel(x_ref, w1m_ref, w1a_ref, b1_ref, w2f_ref, b2f_ref, out_ref,
                  *, k, c):
    xf = x_ref[...].astype(jnp.float32)                       # (1, Sp, Cp)
    pmax = xf.max(axis=1)                                     # (1, Cp)
    psum = xf.sum(axis=1)                                     # (1, Cp)

    # Reduce the k folded lane-groups for the max branch: after maxing with all
    # k-1 rolls by multiples of c, every lane holds the true per-channel max.
    acc = pmax
    for i in range(1, k):
        acc = jnp.maximum(acc, pltpu.roll(pmax, shift=i * c, axis=1))

    # Shared MLP with pre-folded weights:
    #   w1m: [w1; 0; ...]      -> acc  @ w1m == x_max @ w1
    #   w1a: tile(w1, k) / S   -> psum @ w1a == x_avg @ w1
    #   w2f: tile(w2, k), b2f: tile(2*b2, k) -> output already lane-folded.
    h = (jnp.maximum(jnp.dot(acc, w1m_ref[...],
                             preferred_element_type=jnp.float32) + b1_ref[...], 0.0)
         + jnp.maximum(jnp.dot(psum, w1a_ref[...],
                               preferred_element_type=jnp.float32) + b1_ref[...], 0.0))
    att = jax.nn.sigmoid(jnp.dot(h, w2f_ref[...],
                                 preferred_element_type=jnp.float32) + b2f_ref[...])
    out_ref[...] = (xf * att[:, None, :]).astype(out_ref.dtype)


# ---------------------------------------------------------------------------
# Two-pass path, pass 1: global max / sum pooling over the spatial axis.
# grid = (B, Sp // ts); outputs (1, 1, Cp) stay resident across s (accumulator).
# ---------------------------------------------------------------------------
def _pool_kernel(x_ref, max_ref, sum_ref):
    @pl.when(pl.program_id(1) == 0)
    def _():
        max_ref[...] = jnp.full_like(max_ref, -jnp.inf)
        sum_ref[...] = jnp.zeros_like(sum_ref)

    xb = x_ref[...].astype(jnp.float32)                       # (1, ts, Cp)
    max_ref[...] = jnp.maximum(max_ref[...], xb.max(axis=1, keepdims=True))
    sum_ref[...] = sum_ref[...] + xb.sum(axis=1, keepdims=True)


# ---------------------------------------------------------------------------
# Two-pass path, pass 2: pure lane-wise gate multiply (att precomputed on host).
# ---------------------------------------------------------------------------
def _apply_kernel(att_ref, x_ref, out_ref):
    att = att_ref[...].astype(x_ref.dtype)                    # (1, 1, Cp)
    out_ref[...] = (x_ref[...] * att).astype(out_ref.dtype)


def _pick_spatial_tile(sp, row_bytes, *, max_tile=_MAX_SPATIAL_TILE,
                       budget_bytes=_TILE_BUDGET_BYTES, n_buffers=4):
    """Largest spatial tile dividing `sp`, multiple of 8, within the VMEM budget."""
    cap = min(max_tile, max(8, budget_bytes // max(1, row_bytes * n_buffers)))
    if sp <= cap:
        return sp
    t = (cap // 8) * 8
    while t >= 8:
        if sp % t == 0:
            return t
        t -= 8
    # TODO(synk): no aligned divisor <= cap (e.g. huge prime S); fall back to full axis.
    return sp


def channel_att(x, w1, b1, w2, b2, *, force_two_pass=False):
    """x: [B, D, H, W, C]; w1: [C, Ch]; b1: [Ch]/[1,Ch]; w2: [Ch, C]; b2: [C]/[1,C]."""
    B, D, H, W, C = x.shape
    S = D * H * W
    Ch = w1.shape[1]

    w1 = w1.astype(jnp.float32)
    w2 = w2.astype(jnp.float32)
    b1 = b1.reshape(1, Ch).astype(jnp.float32)
    b2 = b2.reshape(1, C).astype(jnp.float32)

    # Lane-dense fold: pack k spatial positions into the lane dimension.
    if C < 128 and 128 % C == 0 and S % (128 // C) == 0:
        k = 128 // C
    else:
        k = 1
    Sp, Cp = S // k, k * C
    xp = x.reshape(B, Sp, Cp)                                  # free (row-major) view
    itemsize = jnp.dtype(x.dtype).itemsize

    # ---- fused single-pass path (x read from HBM exactly once) --------------
    slab_in = Sp * Cp * itemsize
    slab_f32 = Sp * Cp * 4
    fused_footprint = 4 * slab_in + 2 * slab_f32               # 2x in + 2x out + f32 temps
    if not force_two_pass and fused_footprint <= _FUSED_BUDGET_BYTES:
        if k > 1:
            w1_max = jnp.concatenate(
                [w1, jnp.zeros(((k - 1) * C, Ch), jnp.float32)], axis=0)
        else:
            w1_max = w1
        w1_avg = jnp.tile(w1, (k, 1)) * (1.0 / S)
        w2_f = jnp.tile(w2, (1, k))
        b2_f = jnp.tile(2.0 * b2, (1, k))

        out_p = pl.pallas_call(
            functools.partial(_fused_kernel, k=k, c=C),
            out_shape=jax.ShapeDtypeStruct((B, Sp, Cp), x.dtype),
            grid_spec=pltpu.PrefetchScalarGridSpec(
                num_scalar_prefetch=0,
                grid=(B,),
                in_specs=[
                    pl.BlockSpec((1, Sp, Cp), lambda b: (b, 0, 0)),   # x slab
                    pl.BlockSpec((Cp, Ch), lambda b: (0, 0)),         # w1 (max branch)
                    pl.BlockSpec((Cp, Ch), lambda b: (0, 0)),         # w1 (avg branch)
                    pl.BlockSpec((1, Ch), lambda b: (0, 0)),          # b1
                    pl.BlockSpec((Ch, Cp), lambda b: (0, 0)),         # w2 folded
                    pl.BlockSpec((1, Cp), lambda b: (0, 0)),          # 2*b2 folded
                ],
                out_specs=pl.BlockSpec((1, Sp, Cp), lambda b: (b, 0, 0))),
            compiler_params=pltpu.CompilerParams(
                dimension_semantics=("parallel",),
                vmem_limit_bytes=_VMEM_LIMIT_BYTES),
        )(xp, w1_max, w1_avg, b1, w2_f, b2_f)
        return out_p.reshape(B, D, H, W, C)

    # ---- two-pass path -------------------------------------------------------
    ts = _pick_spatial_tile(Sp, Cp * itemsize)

    # pass 1: pooled max / sum over the (folded) spatial axis
    maxp, sump = pl.pallas_call(
        _pool_kernel,
        out_shape=(jax.ShapeDtypeStruct((B, 1, Cp), jnp.float32),
                   jax.ShapeDtypeStruct((B, 1, Cp), jnp.float32)),
        grid_spec=pltpu.PrefetchScalarGridSpec(
            num_scalar_prefetch=0,
            grid=(B, Sp // ts),
            in_specs=[pl.BlockSpec((1, ts, Cp), lambda b, s: (b, s, 0))],
            out_specs=(pl.BlockSpec((1, 1, Cp), lambda b, s: (b, 0, 0)),
                       pl.BlockSpec((1, 1, Cp), lambda b, s: (b, 0, 0)))),
        compiler_params=pltpu.CompilerParams(
            dimension_semantics=("parallel", "arbitrary"),
            vmem_limit_bytes=_VMEM_LIMIT_BYTES),
    )(xp)

    # tiny MLP + sigmoid hoisted to plain JAX (O(B*C*Ch) flops, negligible)
    pm = maxp.reshape(B, k, C).max(axis=1)                     # (B, C)
    ps = sump.reshape(B, k, C).sum(axis=1)                     # (B, C)
    avg = ps * (1.0 / S)
    h = (jnp.maximum(pm @ w1 + b1, 0.0) + jnp.maximum(avg @ w1 + b1, 0.0))
    att = jax.nn.sigmoid(h @ w2 + 2.0 * b2)                    # (B, C)
    att_p = jnp.tile(att, (1, k))[:, None, :]                  # (B, 1, Cp), f32

    # pass 2: broadcast gate multiply
    out_p = pl.pallas_call(
        _apply_kernel,
        out_shape=jax.ShapeDtypeStruct((B, Sp, Cp), x.dtype),
        grid_spec=pltpu.PrefetchScalarGridSpec(
            num_scalar_prefetch=0,
            grid=(B, Sp // ts),
            in_specs=[pl.BlockSpec((1, 1, Cp), lambda b, s: (b, 0, 0)),
                      pl.BlockSpec((1, ts, Cp), lambda b, s: (b, s, 0))],
            out_specs=pl.BlockSpec((1, ts, Cp), lambda b, s: (b, s, 0))),
        compiler_params=pltpu.CompilerParams(
            dimension_semantics=("parallel", "parallel"),
            vmem_limit_bytes=_VMEM_LIMIT_BYTES),
    )(att_p, xp)

    return out_p.reshape(B, D, H, W, C)


def channel_att_ref(x, w1, b1, w2, b2):
    """Pure-JAX reference mirroring the PyTorch module semantics."""
    B, D, H, W, C = x.shape
    x3 = x.reshape(B, -1, C).astype(jnp.float32)
    x_max = x3.max(axis=1)                                     # (B, C)
    x_avg = x3.mean(axis=1)                                    # (B, C)

    def mlp(v):
        return jnp.maximum(v @ w1 + b1.reshape(1, -1), 0.0) @ w2 + b2.reshape(1, -1)

    att = jax.nn.sigmoid(mlp(x_max) + mlp(x_avg))              # (B, C)
    return (x.astype(jnp.float32) * att[:, None, None, None, :]).astype(x.dtype)


if __name__ == "__main__":
    key = jax.random.PRNGKey(0)
    B, D, H, W, C = 2, 4, 8, 8, 32
    ratio = 8
    Ch = C // ratio

    keys = jax.random.split(key, 5)
    x = jax.random.normal(keys[0], (B, D, H, W, C), jnp.float32)

    # Deterministic param init (PyTorch-Linear-style uniform +/- 1/sqrt(fan_in)).
    lim1 = 1.0 / (C ** 0.5)
    lim2 = 1.0 / (Ch ** 0.5)
    w1 = jax.random.uniform(keys[1], (C, Ch), jnp.float32, -lim1, lim1)
    b1 = jax.random.uniform(keys[2], (1, Ch), jnp.float32, -lim1, lim1)
    w2 = jax.random.uniform(keys[3], (Ch, C), jnp.float32, -lim2, lim2)
    b2 = jax.random.uniform(keys[4], (1, C), jnp.float32, -lim2, lim2)

    ref = channel_att_ref(x, w1, b1, w2, b2)

    # Exercise both code paths: fused single-pass and two-pass fallback.
    out_fused = jax.block_until_ready(channel_att(x, w1, b1, w2, b2))
    out_two = jax.block_until_ready(channel_att(x, w1, b1, w2, b2, force_two_pass=True))

    for out in (out_fused, out_two):
        assert out.shape == x.shape and out.dtype == x.dtype
        err = float(jnp.max(jnp.abs(out.astype(jnp.float32) - ref.astype(jnp.float32))))
        assert err < 2e-5, err
    print("KERNEL_OK")
</pallas_src>

<mosaic_0001>
module attributes {stable_mosaic.version = 11 : i64} {
  func.func @_fused_kernel(%arg0: i32, %arg1: memref<1x64x128xf32, #tpu.memory_space<vmem>>, %arg2: memref<128x4xf32, #tpu.memory_space<vmem>>, %arg3: memref<128x4xf32, #tpu.memory_space<vmem>>, %arg4: memref<1x4xf32, #tpu.memory_space<vmem>>, %arg5: memref<4x128xf32, #tpu.memory_space<vmem>>, %arg6: memref<1x128xf32, #tpu.memory_space<vmem>>, %arg7: memref<1x64x128xf32, #tpu.memory_space<vmem>>) attributes {dimension_semantics = [#tpu.dimension_semantics<parallel>], iteration_bounds = array<i64: 2>, scalar_prefetch = 0 : i64, scratch_operands = 0 : i64, tpu.core_type = #tpu.core_type<tc>, window_params = [{transform_indices = @transform_0, window_bounds = array<i64: 1, 64, 128>}, {pipeline_mode = #tpu.pipeline_mode<synchronous>, transform_indices = @transform_1, window_bounds = array<i64: 128, 4>}, {pipeline_mode = #tpu.pipeline_mode<synchronous>, transform_indices = @transform_2, window_bounds = array<i64: 128, 4>}, {pipeline_mode = #tpu.pipeline_mode<synchronous>, transform_indices = @transform_3, window_bounds = array<i64: 1, 4>}, {pipeline_mode = #tpu.pipeline_mode<synchronous>, transform_indices = @transform_4, window_bounds = array<i64: 4, 128>}, {pipeline_mode = #tpu.pipeline_mode<synchronous>, transform_indices = @transform_5, window_bounds = array<i64: 1, 128>}, {transform_indices = @transform_6, window_bounds = array<i64: 1, 64, 128>}]} {
    %c0 = arith.constant 0 : index
    %c0_0 = arith.constant 0 : index
    %c0_1 = arith.constant 0 : index
    %0 = vector.load %arg1[%c0, %c0_0, %c0_1] : memref<1x64x128xf32, #tpu.memory_space<vmem>>, vector<1x64x128xf32>
    %cst = arith.constant dense<0xFF800000> : vector<1x128xf32>
    %1 = vector.multi_reduction <maximumf>, %0, %cst [1] : vector<1x64x128xf32> to vector<1x128xf32>
    %cst_2 = arith.constant dense<0.000000e+00> : vector<1x128xf32>
    %2 = vector.multi_reduction <add>, %0, %cst_2 [1] : vector<1x64x128xf32> to vector<1x128xf32>
    %c32_i32 = arith.constant 32 : i32
    %3 = tpu.dynamic_rotate %1 by %c32_i32 dim 1 : vector<1x128xf32>, i32 -> vector<1x128xf32>
    %4 = arith.maximumf %1, %3 : vector<1x128xf32>
    %c64_i32 = arith.constant 64 : i32
    %5 = tpu.dynamic_rotate %1 by %c64_i32 dim 1 : vector<1x128xf32>, i32 -> vector<1x128xf32>
    %6 = arith.maximumf %4, %5 : vector<1x128xf32>
    %c96_i32 = arith.constant 96 : i32
    %7 = tpu.dynamic_rotate %1 by %c96_i32 dim 1 : vector<1x128xf32>, i32 -> vector<1x128xf32>
    %8 = arith.maximumf %6, %7 : vector<1x128xf32>
    %c0_3 = arith.constant 0 : index
    %c0_4 = arith.constant 0 : index
    %9 = vector.load %arg2[%c0_3, %c0_4] : memref<128x4xf32, #tpu.memory_space<vmem>>, vector<128x4xf32>
    %cst_5 = arith.constant dense<0.000000e+00> : vector<1x4xf32>
    %10 = tpu.matmul %8, %9, %cst_5 {dimension_numbers = #tpu.dot_dimension_numbers<[1], [0], [0], [1], [0, 0, 1, 1], [], []>} : vector<1x128xf32>, vector<128x4xf32>, vector<1x4xf32> -> vector<1x4xf32>
    %c0_6 = arith.constant 0 : index
    %c0_7 = arith.constant 0 : index
    %11 = vector.load %arg4[%c0_6, %c0_7] : memref<1x4xf32, #tpu.memory_space<vmem>>, vector<1x4xf32>
    %12 = arith.addf %10, %11 : vector<1x4xf32>
    %cst_8 = arith.constant 0.000000e+00 : f32
    %13 = vector.broadcast %cst_8 : f32 to vector<1x4xf32>
    %14 = arith.maximumf %12, %13 : vector<1x4xf32>
    %c0_9 = arith.constant 0 : index
    %c0_10 = arith.constant 0 : index
    %15 = vector.load %arg3[%c0_9, %c0_10] : memref<128x4xf32, #tpu.memory_space<vmem>>, vector<128x4xf32>
    %cst_11 = arith.constant dense<0.000000e+00> : vector<1x4xf32>
    %16 = tpu.matmul %2, %15, %cst_11 {dimension_numbers = #tpu.dot_dimension_numbers<[1], [0], [0], [1], [0, 0, 1, 1], [], []>} : vector<1x128xf32>, vector<128x4xf32>, vector<1x4xf32> -> vector<1x4xf32>
    %c0_12 = arith.constant 0 : index
    %c0_13 = arith.constant 0 : index
    %17 = vector.load %arg4[%c0_12, %c0_13] : memref<1x4xf32, #tpu.memory_space<vmem>>, vector<1x4xf32>
    %18 = arith.addf %16, %17 : vector<1x4xf32>
    %cst_14 = arith.constant 0.000000e+00 : f32
    %19 = vector.broadcast %cst_14 : f32 to vector<1x4xf32>
    %20 = arith.maximumf %18, %19 : vector<1x4xf32>
    %21 = arith.addf %14, %20 : vector<1x4xf32>
    %c0_15 = arith.constant 0 : index
    %c0_16 = arith.constant 0 : index
    %22 = vector.load %arg5[%c0_15, %c0_16] : memref<4x128xf32, #tpu.memory_space<vmem>>, vector<4x128xf32>
    %cst_17 = arith.constant dense<0.000000e+00> : vector<1x128xf32>
    %23 = tpu.matmul %21, %22, %cst_17 {dimension_numbers = #tpu.dot_dimension_numbers<[1], [0], [0], [1], [0, 0, 1, 1], [], []>} : vector<1x4xf32>, vector<4x128xf32>, vector<1x128xf32> -> vector<1x128xf32>
    %c0_18 = arith.constant 0 : index
    %c0_19 = arith.constant 0 : index
    %24 = vector.load %arg6[%c0_18, %c0_19] : memref<1x128xf32, #tpu.memory_space<vmem>>, vector<1x128xf32>
    %25 = arith.addf %23, %24 : vector<1x128xf32>
    %26 = arith.negf %25 : vector<1x128xf32>
    %27 = math.exp %26 : vector<1x128xf32>
    %cst_20 = arith.constant 1.000000e+00 : f32
    %28 = vector.broadcast %cst_20 : f32 to vector<1x128xf32>
    %29 = arith.addf %28, %27 : vector<1x128xf32>
    %30 = arith.divf %28, %29 : vector<1x128xf32>
    %31 = vector.shape_cast %30 : vector<1x128xf32> to vector<1x1x128xf32>
    %32 = vector.broadcast %31 : vector<1x1x128xf32> to vector<1x64x128xf32>
    %33 = arith.mulf %0, %32 : vector<1x64x128xf32>
    %c0_21 = arith.constant 0 : index
    %c0_22 = arith.constant 0 : index
    %c0_23 = arith.constant 0 : index
    %34 = vector.load %arg7[%c0_21, %c0_22, %c0_23] : memref<1x64x128xf32, #tpu.memory_space<vmem>>, vector<1x64x128xf32>
    tpu.vector_store %arg7[%c0_21, %c0_22, %c0_23], %33 {strides = array<i32>} : memref<1x64x128xf32, #tpu.memory_space<vmem>>, vector<1x64x128xf32>,
    return
  }
  func.func @transform_0(%arg0: i32) -> (i32, i32, i32) {
    %c0_i32 = arith.constant 0 : i32
    %c0_i32_0 = arith.constant 0 : i32
    %c0_i32_1 = arith.constant 0 : i32
    return %arg0, %c0_i32, %c0_i32_0 : i32, i32, i32
  }
  func.func @transform_1(%arg0: i32) -> (i32, i32) {
    %c0_i32 = arith.constant 0 : i32
    %c0_i32_0 = arith.constant 0 : i32
    %c0_i32_1 = arith.constant 0 : i32
    return %c0_i32, %c0_i32_0 : i32, i32
  }
  func.func @transform_2(%arg0: i32) -> (i32, i32) {
    %c0_i32 = arith.constant 0 : i32
    %c0_i32_0 = arith.constant 0 : i32
    %c0_i32_1 = arith.constant 0 : i32
    return %c0_i32, %c0_i32_0 : i32, i32
  }
  func.func @transform_3(%arg0: i32) -> (i32, i32) {
    %c0_i32 = arith.constant 0 : i32
    %c0_i32_0 = arith.constant 0 : i32
    %c0_i32_1 = arith.constant 0 : i32
    return %c0_i32, %c0_i32_0 : i32, i32
  }
  func.func @transform_4(%arg0: i32) -> (i32, i32) {
    %c0_i32 = arith.constant 0 : i32
    %c0_i32_0 = arith.constant 0 : i32
    %c0_i32_1 = arith.constant 0 : i32
    return %c0_i32, %c0_i32_0 : i32, i32
  }
  func.func @transform_5(%arg0: i32) -> (i32, i32) {
    %c0_i32 = arith.constant 0 : i32
    %c0_i32_0 = arith.constant 0 : i32
    %c0_i32_1 = arith.constant 0 : i32
    return %c0_i32, %c0_i32_0 : i32, i32
  }
  func.func @transform_6(%arg0: i32) -> (i32, i32, i32) {
    %c0_i32 = arith.constant 0 : i32
    %c0_i32_0 = arith.constant 0 : i32
    %c0_i32_1 = arith.constant 0 : i32
    return %arg0, %c0_i32, %c0_i32_0 : i32, i32, i32
  }
}

</mosaic_0001>

<bundles_post_ra>
// kernel: tpu_custom_call.1
= control target key start
LH: loop header
LB: loop body
LE: loop exit
PB: predicated region body
PF: predicated region fallthrough
CT: control target
= control target key end

     0   :  { %11 = vsyncpa [#allocation3], 0  ;;  %s1217_s0 = inlined_call_operand.vmem [shape: f32[2,64,128], index: 0, kind: input, shape index: {}]   ;;  %s1218_s1 = inlined_call_operand.vmem [shape: f32[128,4], index: 1, kind: input, shape index: {}]   ;;  %s1219_s2 = inlined_call_operand.vmem [shape: f32[128,4], index: 2, kind: input, shape index: {}]   ;;  %s1220_s3 = inlined_call_operand.vmem [shape: f32[1,4], index: 3, kind: input, shape index: {}]   ;;  %s1221_s4 = inlined_call_operand.vmem [shape: f32[4,128], index: 4, kind: input, shape index: {}]   ;;  %s1222_s5 = inlined_call_operand.vmem [shape: f32[1,128], index: 5, kind: input, shape index: {}]   ;;  %s1223_s6 = inlined_call_operand.hbm [shape: f32[2,64,128], index: 6, kind: output, shape index: {}]  }
   0x1   :  { %13 = vsyncpa [#allocation3 + $0x1], 0  ;;  %s934_s21 = smov 0   ;;  %s936_s22 = smov 0  }
   0x2   :  { %s938_s23 = smov 0   ;;  %s940_s24 = smov 0  }
   0x3 LB: > { %s955_s25 = sadd.s32 4294967295, %s889_s24   ;;  %s651_s26 = sadd.s32 4294967294, %s889_s24   ;;  %s889_s24 = sphi %s940_s24, %s1229_s24   ;;  %s885_s23 = sphi %s938_s23, %s1228_s23   ;;  %s881_s22 = sphi %s936_s22, %s1227_s22   ;;  %s877_s21 = sphi %s934_s21, %s1226_s21  }
   0x4   : > { %s959_s27 = sadd.s32 1, %s889_s24   ;;  %s157_s28 = sadd.s32 1, %s885_s23 }
   0x5   : > { %s154_s29 = ssub.s32 %s889_s24, %s959_s27  ;;  %p167_p0 = scmp.ne.s32.totalorder %s885_s23, %s881_s22 }
   0x6   : > { %p155_p1 = scmp.eq.s32.totalorder %s154_s29, 0  ;;  %p168_p2 = scmp.eq.s32.totalorder %s955_s25, 1 }
   0x7   : > { %p173_p3 = scmp.ne.s32.totalorder %s881_s22, %s877_s21  ;;  %p174_p4 = scmp.eq.s32.totalorder %s651_s26, 1 }
   0x8   : > { %s970_s30 = scalar_select %p155_p1, %s885_s23, %s157_s28  }
   0x9   : > { %p972_p5 = por %p168_p2, %p167_p0  ;;  %p976_p6 = por %p174_p4, %p173_p3 }
   0xa   : > { %p654_p7 = scmp.ge.s32.totalorder %s889_s24, 1  ;;  %p215_p8 = scmp.lt.s32.totalorder %s889_s24, 3 }
   0xc   : > { %p216_p9 = pnand %p654_p7, %p215_p8 }
   0xd   : > { %p245_p10 = scmp.lt.s32.totalorder (!%p216_p9), %s955_s25, 1  ;;  %s892_s10 = smov (!%p216_p9), 32  }
   0xe   : > { %219 = sbr.rel (%p216_p9) target bundleno = 616 (0x268), region = 44  ;;  %s893_s11 = smov (!%p216_p9), 96  }
   0xf   : > { %s894_s18 = smov (!%p216_p9), 64   ;;  %s667_s14 = sshll.u32 (!%p216_p9), %s955_s25, 10 }
  0x10   : > { %s1169_s19 = scalar_lea.hbm (!%p216_p9), %s1223_s6, %s667_s14  ;;  %s896_s26 = smov (!%p216_p9), [#allocation2]  }
  0x13   : > { %v396_v0 = vld [vmem:[%s1219_s2 + $0x78] sm:$0xff]  ;;  %v891_v2 = vmov 0.0   ;;  %v395_v3 = vld [vmem:[%s1219_s2 + $0x70] sm:$0xff]  ;;  %s246_s17 = scalar_select %p245_p10, %s955_s25, 1  ;;  %v394_v5 = vld [vmem:[%s1219_s2 + $0x68] sm:$0xff]  ;;  %vm895_vm0 = vmmov 0  }
  0x14   : > { %v308_v1 = vld [vmem:[%s1218_s1 + $0x78] sm:$0xff]  ;;  %739 = vmatprep.subr.mxu1 %v891_v2  ;;  %704 = vmatprep.subr.mxu0 %v891_v2  ;;  %v307_v4 = vld [vmem:[%s1218_s1 + $0x70] sm:$0xff]  ;;  %v306_v6 = vld [vmem:[%s1218_s1 + $0x68] sm:$0xff]  ;;  %vm475_vm1 = vcmask 1043456   ;;  %vm471_vm2 = vcmask 31744  }
  0x15   : > { %740 = vmatpush3.msra.mxu1 %v396_v0  ;;  %705 = vmatpush3.msra.mxu0 %v308_v1  ;;  %s666_s28 = sshll.u32 %s246_s17, 6  ;;  %v393_v7 = vld [vmem:[%s1219_s2 + $0x60] sm:$0xff]  ;;  %v392_v9 = vld [vmem:[%s1219_s2 + $0x58] sm:$0xff]  ;;  %v391_v24 = vld [vmem:[%s1219_s2 + $0x50] sm:$0xff] }
  0x16   : > { %741 = vmatprep.subr.mxu1 %v891_v2  ;;  %706 = vmatprep.subr.mxu0 %v891_v2  ;;  %s249_s12 = scalar_lea.vmem %s1217_s0, %s666_s28  ;;  %v305_v8 = vld [vmem:[%s1218_s1 + $0x60] sm:$0xff]  ;;  %v304_v10 = vld [vmem:[%s1218_s1 + $0x58] sm:$0xff]  ;;  %v303_v25 = vld [vmem:[%s1218_s1 + $0x50] sm:$0xff]  ;;  %s833_s28 = sshll.u32 %s896_s26, 4  ;;  %s834_s28 = int_to_ptr.vmem [resolvable:$false] %s833_s28 }
  0x17   : > { %742 = vmatpush3.msra.mxu1 %v395_v3  ;;  %707 = vmatpush3.msra.mxu0 %v307_v4  ;;  %v1023_v11 = vld [vmem:[%s249_s12] sm:$0xff]  ;;  %v1025_v12 = vld [vmem:[%s249_s12 + $0x8] sm:$0xff]  ;;  %v1027_v13 = vld [vmem:[%s249_s12 + $0x10] sm:$0xff]  ;;  %s835_s29 = scalar_lea.vmem %s834_s28, 2048 }
  0x18   : > { %743 = vmatprep.subr.mxu1 %v891_v2  ;;  %708 = vmatprep.subr.mxu0 %v891_v2  ;;  %v1029_v14 = vld [vmem:[%s249_s12 + $0x18] sm:$0xff]  ;;  %v1031_v15 = vld [vmem:[%s249_s12 + $0x20] sm:$0xff]  ;;  %v1033_v16 = vld [vmem:[%s249_s12 + $0x28] sm:$0xff]  ;;  %v271_v17 = vadd.f32 %v1025_v12, %v1023_v11 }
  0x19   : > { %744 = vmatpush3.msra.mxu1 %v394_v5  ;;  %709 = vmatpush3.msra.mxu0 %v306_v6  ;;  %v1039_v18 = vld [vmem:[%s249_s12 + $0x30] sm:$0xff]  ;;  %v1041_v19 = vld [vmem:[%s249_s12 + $0x38] sm:$0xff]  ;;  %v258_v20 = vmax.f32 %v1023_v11, %v1031_v15  ;;  %v259_v21 = vmax.f32 %v1025_v12, %v1033_v16  ;;  %v390_v29 = vld [vmem:[%s1219_s2 + $0x48] sm:$0xff]  ;;  %s242_s12 = sand.u32 1, %s881_s22  }
  0x1a   : > { %745 = vmatprep.subr.mxu1 %v891_v2  ;;  %710 = vmatprep.subr.mxu0 %v891_v2  ;;  %v260_v22 = vmax.f32 %v1027_v13, %v1039_v18  ;;  %v261_v23 = vmax.f32 %v1029_v14, %v1041_v19  ;;  %v272_v26 = vadd.f32 %v271_v17, %v1027_v13  ;;  %v302_v30 = vld [vmem:[%s1218_s1 + $0x48] sm:$0xff]  ;;  %v389_v33 = vld [vmem:[%s1219_s2 + $0x40] sm:$0xff]  ;;  %v388_v37 = vld [vmem:[%s1219_s2 + $0x38] sm:$0xff]  ;;  %s655_s13 = sshll.u32 %s242_s12, 6  ;;  %s1177_s25 = scalar_lea.sflag [#allocation3], %s242_s12 }
  0x1b   : > { %746 = vmatpush3.msra.mxu1 %v393_v7  ;;  %711 = vmatpush3.msra.mxu0 %v305_v8  ;;  %v262_v27 = vmax.f32 %v258_v20, %v259_v21  ;;  %v301_v34 = vld [vmem:[%s1218_s1 + $0x40] sm:$0xff]  ;;  %v300_v38 = vld [vmem:[%s1218_s1 + $0x38] sm:$0xff]  ;;  %v387_v41 = vld [vmem:[%s1219_s2 + $0x30] sm:$0xff]  ;;  %s244_s15 = scalar_lea.vmem [#allocation2], %s655_s13 }
  0x1c   : > { %747 = vmatprep.subr.mxu1 %v891_v2  ;;  %712 = vmatprep.subr.mxu0 %v891_v2  ;;  %v263_v28 = vmax.f32 %v260_v22, %v261_v23  ;;  %v273_v31 = vadd.f32 %v272_v26, %v1029_v14  ;;  %v299_v42 = vld [vmem:[%s1218_s1 + $0x30] sm:$0xff]  ;;  %v386_v45 = vld [vmem:[%s1219_s2 + $0x28] sm:$0xff]  ;;  %v385_v49 = vld [vmem:[%s1219_s2 + $0x20] sm:$0xff]  ;;  %s589_s16 = sshll.u32 %s244_s15, 4  ;;  %s1171_s16 = int_to_ptr.vmem [resolvable:$true] %s589_s16 }
  0x1d   : > { %748 = vmatpush3.msra.mxu1 %v392_v9  ;;  %713 = vmatpush3.msra.mxu0 %v304_v10  ;;  %v298_v46 = vld [vmem:[%s1218_s1 + $0x28] sm:$0xff]  ;;  %v297_v50 = vld [vmem:[%s1218_s1 + $0x20] sm:$0xff]  ;;  %v384_v53 = vld [vmem:[%s1219_s2 + $0x18] sm:$0xff]  ;;  %s829_s20 = scalar_lea.vmem %s1171_s16, 1024  ;;  %p836_p0 = scmp.lt.s32.totalorder %s1171_s16, %s834_s28 }
  0x1e   : > { %749 = vmatprep.subr.mxu1 %v891_v2  ;;  %714 = vmatprep.subr.mxu0 %v891_v2  ;;  %v264_v32 = vmax.f32 %v262_v27, %v263_v28  ;;  %v274_v35 = vadd.f32 %v273_v31, %v1031_v15  ;;  %v296_v54 = vld [vmem:[%s1218_s1 + $0x18] sm:$0xff]  ;;  %v383_v58 = vld [vmem:[%s1219_s2 + $0x10] sm:$0xff]  ;;  %v382_v61 = vld [vmem:[%s1219_s2 + $0x8] sm:$0xff]  ;;  %p830_p11 = scmp.ne.s32.totalorder %s1171_s16, %s829_s20  ;;  %p837_p1 = scmp.lt.s32.totalorder %s835_s29, %s829_s20 }
  0x1f   : > { %750 = vmatpush3.msra.mxu1 %v391_v24  ;;  %715 = vmatpush3.msra.mxu0 %v303_v25  ;;  %v295_v59 = vld [vmem:[%s1218_s1 + $0x10] sm:$0xff]  ;;  %v294_v62 = vld [vmem:[%s1218_s1 + $0x8] sm:$0xff]  ;;  %v381_v0 = vld [vmem:[%s1219_s2] sm:$0xff] }
  0x20   : > { %751 = vmatprep.subr.mxu1 %v891_v2  ;;  %716 = vmatprep.subr.mxu0 %v891_v2  ;;  %v265_v36 = vrot.slane %v264_v32, 4  ;;  %v275_v39 = vadd.f32 %v274_v35, %v1033_v16  ;;  %v293_v3 = vld [vmem:[%s1218_s1] sm:$0xff]  ;;  %v555_v35 = vlaneseq  ;;  %p831_p12 = pnand %p830_p11, %p972_p5  ;;  %p838_p2 = por %p837_p1, %p836_p0 }
  0x21   : > { %752 = vmatpush3.msra.mxu1 %v390_v29  ;;  %717 = vmatpush3.msra.mxu0 %v302_v30  ;;  %v469_v10 = vld [vmem:[%s1221_s4] sm:$0xf] }
  0x22   : > { %753 = vmatprep.subr.mxu1 %v891_v2  ;;  %718 = vmatprep.subr.mxu0 %v891_v2  ;;  %v266_v40 = vmax.f32 %v264_v32, %v265_v36  ;;  %v276_v43 = vadd.f32 %v275_v39, %v1039_v18  ;;  %v309_v21 = vld [vmem:[%s1220_s3] sm:$0x1]  ;;  %v556_v36 = vshrl.u32 %v555_v35, 7  ;;  %p832_p13 = pneg %p831_p12 }
  0x23   : > { %754 = vmatpush3.msra.mxu1 %v389_v33  ;;  %719 = vmatpush3.msra.mxu0 %v301_v34  ;;  %v470_v28 = vld [vmem:[%s1222_s5] sm:$0x1] }
  0x24   : > { %755 = vmatprep.subr.mxu1 %v891_v2  ;;  %720 = vmatprep.subr.mxu0 %v891_v2  ;;  %v267_v44 = vrot.slane %v266_v40, 2  ;;  %v277_v47 = vadd.f32 %v276_v43, %v1041_v19  ;;  %p839_p3 = pnand %p838_p2, %p832_p13 }
  0x25   : > { %756 = vmatpush3.msra.mxu1 %v388_v37  ;;  %721 = vmatpush3.msra.mxu0 %v300_v38  ;;  %v557_v37 = vsub.s32 0, %v556_v36 }
  0x26   : > { %757 = vmatprep.subr.mxu1 %v891_v2  ;;  %722 = vmatprep.subr.mxu0 %v891_v2  ;;  %v268_v48 = vmax.f32 %v266_v40, %v267_v44  ;;  %v278_v51 = vrot.slane %v277_v47, 4 }
  0x27   : > { %758 = vmatpush3.msra.mxu1 %v387_v41  ;;  %723 = vmatpush3.msra.mxu0 %v299_v42 }
  0x28   : > { %759 = vmatprep.subr.mxu1 %v891_v2  ;;  %724 = vmatprep.subr.mxu0 %v891_v2  ;;  %v269_v52 = vrot.slane %v268_v48, 1  ;;  %v279_v55 = vadd.f32 %v278_v51, %v277_v47 }
  0x29   : > { %760 = vmatpush3.msra.mxu1 %v386_v45  ;;  %725 = vmatpush3.msra.mxu0 %v298_v46 }
  0x2a   : > { %761 = vmatprep.subr.mxu1 %v891_v2  ;;  %726 = vmatprep.subr.mxu0 %v891_v2  ;;  %v270_v56 = vmax.f32 %v268_v48, %v269_v52  ;;  %v280_v57 = vrot.slane %v279_v55, 2 }
  0x2b   : > { %762 = vmatpush3.msra.mxu1 %v385_v49  ;;  %727 = vmatpush3.msra.mxu0 %v297_v50 }
  0x2c   : > { %763 = vmatprep.subr.mxu1 %v891_v2  ;;  %728 = vmatprep.subr.mxu0 %v891_v2  ;;  %v281_v60 = vadd.f32 %v280_v57, %v279_v55 }
  0x2d   : > { %764 = vmatpush3.msra.mxu1 %v384_v53  ;;  %729 = vmatpush3.msra.mxu0 %v296_v54 }
  0x2e   : > { %284 = vrot.lane.b32.xlu0 %v270_v56, %s892_s10  ;;  %290 = vrot.lane.b32.xlu1 %v270_v56, %s893_s11  ;;  %v282_v63 = vrot.slane %v281_v60, 1 }
  0x2f   : > { %765 = vmatprep.subr.mxu1 %v891_v2  ;;  %730 = vmatprep.subr.mxu0 %v891_v2 }
  0x30   : > { %766 = vmatpush3.msra.mxu1 %v383_v58  ;;  %731 = vmatpush3.msra.mxu0 %v295_v59  ;;  %v283_v1 = vadd.f32 %v282_v63, %v281_v60 }
  0x31   : > { %767 = vmatprep.subr.mxu1 %v891_v2  ;;  %732 = vmatprep.subr.mxu0 %v891_v2 }
  0x32   : > { %287 = vrot.lane.b32.xlu0 %v270_v56, %s894_s18  ;;  %768 = vmatpush3.msra.mxu1 %v382_v61 }
  0x33   : > { %769 = vmatprep.subr.mxu1 %v891_v2  ;;  %733 = vmatpush3.msra.mxu0 %v294_v62 }
  0x34   : > { %770 = vmatpush3.msra.mxu1 %v381_v0  ;;  %771 = vmatprep.mubr.msk.f32.mxu1 %vm895_vm0, %v891_v2 }
  0x35   : > { %734 = vmatprep.subr.mxu0 %v891_v2  ;;  %772 = vmatmul.mubr.f32.vlgmr.msra.gmra.mxu1 %v283_v1 }
  0x36   : > { %735 = vmatpush3.msra.mxu0 %v293_v3  ;;  %736 = vmatprep.mubr.msk.f32.mxu0 %vm895_vm0, %v891_v2 }
  0x37   : > { %774 = vmatprep.subr.mxu0 %v891_v2 }
  0xa0   : > { %v285_v4 = vpop.permute.xlu0 %284  ;;  %v291_v7 = vpop.permute.xlu1 %290 }
  0xa1   : > { %v286_v5 = vmax.f32 %v270_v56, %v285_v4 }
  0xa4   : > { %v288_v6 = vpop.permute.xlu0 %287 }
  0xa5   : > { %v289_v8 = vmax.f32 %v286_v5, %v288_v6 }
  0xa7   : > { %v292_v9 = vmax.f32 %v289_v8, %v291_v7 }
  0xa9   : > { %737 = vmatmul.mubr.f32.vlgmr.msra.gmra.mxu0 %v292_v9 }
  0xaa   : > { %776 = vmatprep.mubr.msk.f32.mxu0 %vm895_vm0, %v891_v2  ;;  %775 = vmatpush3.msk.msra.mxu0 %vm475_vm1, %v469_v10 }
  0xf5   : > { %v463_v17 = vpop.f32.mrf.mxu1 }
  0xf6   : > { %v464_v22 = vadd.f32 %v463_v17, %v309_v21 }
  0xf7   : > { %v773_v20 = vpop.f32.mrf.mxu1 }
  0xf8   : > { %v467_v24 = vmax.f32 %v464_v22, 0.0 }
 0x169   : > { %v376_v23 = vpop.f32.mrf.mxu0 }
 0x16a   : > { %v377_v25 = vadd.f32 %v376_v23, %v309_v21 }
 0x16b   : > { %v738_v26 = vpop.f32.mrf.mxu0 }
 0x16c   : > { %v380_v27 = vmax.f32 %v377_v25, 0.0 }
 0x16e   : > { %v468_v2 = vadd.f32 %v467_v24, %v380_v27 }
 0x170   : > { %777 = vmatmul.mubr.msk.f32.vlgmr.msra.gmra.mxu0 %vm471_vm2, %v468_v2 }
 0x230   : > { %v545_v29 = vpop.f32.mrf.mxu0 }
 0x231   : > { %v546_v30 = vadd.f32 %v545_v29, %v470_v28 }
 0x232   : > { %v778_v31 = vpop.f32.mrf.mxu0 }
 0x233   : > { %v660_v32 = vmul.f32 -1.442695, %v546_v30 }
 0x235   : > { %825 = vpow2.f32 %v660_v32 }
 0x242   : > { %v826_v33 = vpop.eup %825 }
 0x243   : > { %v552_v34 = vadd.f32 1.0, %v826_v33 }
 0x245   : > { %827 = vrcp.f32 %v552_v34 }
 0x252   : > { %v828_v38 = vpop.eup %827 }
 0x253   : > { %v558_v39 = vrot.slane %v828_v38, %v557_v37 }
 0x255   : > { %v559_v40 = vmul.f32 %v558_v39, %v1023_v11  ;;  %v560_v41 = vmul.f32 %v558_v39, %v1025_v12  ;;  %v561_v42 = vmul.f32 %v558_v39, %v1027_v13  ;;  %v562_v43 = vmul.f32 %v558_v39, %v1029_v14 }
 0x256   : > { %v563_v44 = vmul.f32 %v558_v39, %v1031_v15  ;;  %v564_v11 = vmul.f32 %v558_v39, %v1033_v16  ;;  %v565_v12 = vmul.f32 %v558_v39, %v1039_v18  ;;  %v566_v13 = vmul.f32 %v558_v39, %v1041_v19 }
 0x257   : > { %567 = vst [vmem:[%s244_s15] sm:$0xff] %v559_v40  ;;  %568 = vst [vmem:[%s244_s15 + $0x8] sm:$0xff] %v560_v41 }
 0x258   : > { %569 = vst [vmem:[%s244_s15 + $0x10] sm:$0xff] %v561_v42  ;;  %570 = vst [vmem:[%s244_s15 + $0x18] sm:$0xff] %v562_v43 }
 0x259   : > { %571 = vst [vmem:[%s244_s15 + $0x20] sm:$0xff] %v563_v44  ;;  %572 = vst [vmem:[%s244_s15 + $0x28] sm:$0xff] %v564_v11 }
 0x25a   : > { %573 = vst [vmem:[%s244_s15 + $0x30] sm:$0xff] %v565_v12  ;;  %574 = vst [vmem:[%s244_s15 + $0x38] sm:$0xff] %v566_v13 }
 0x25b   : > { %842 = shalt.err (!%p839_p3)
}
 0x25c   : > { %s843_s9 = scalar_lea.hbm %s1169_s19, 1024  ;;  %s847_s12 = scalar_lea.hbm %s1223_s6, 2048 }
 0x25d   : > { %p844_p4 = scmp.ne.s32.totalorder %s1169_s19, %s843_s9  ;;  %p848_p9 = scmp.lt.s32.totalorder %s1169_s19, %s1223_s6 }
 0x25e   : > { %p849_p10 = scmp.lt.s32.totalorder %s847_s12, %s843_s9 }
 0x25f   : > { %p845_p7 = pnand %p844_p4, %p972_p5 }
 0x260   : > { %p850_p11 = por %p849_p10, %p848_p9 }
 0x261   : > { %p846_p8 = pneg %p845_p7 }
 0x263   : > { %p851_p12 = pnand %p850_p11, %p846_p8 }
 0x265   : > { %854 = shalt.err (!%p851_p12)
}
 0x266   : > { %s897_s15 = smov 128   ;;  %s898_s17 = smov 8  }
 0x267   : > { %779 = dma.vmem_to_hbm [thread:$0]  (%p972_p5), %s1171_s16, 1024, %s1169_s19, %s1177_s25, %s897_s15, %s897_s15, %s898_s17  }
 0x268 PF: > { %p785_p13 = scmp.ge.s32.totalorder %s889_s24, 2  ;;  %s604_s18 = sand.u32 1, %s877_s21  }
 0x269   : > { %s605_s20 = scalar_lea.sflag [#allocation3], %s604_s18 }
 0x26a   : > { %p782_p0 = pnand %p785_p13, %p976_p6 }
 0x26c   : > { %p783_p1 = pneg %p782_p0 }
 0x26e   : > { %872 = dma.done.wait (%p783_p1), %s605_s20, 1024  }
 0x26f   : > { %874 = vsyncadd (%p783_p1), %s605_s20, 4294966272  ;;  %p16_p2 = scmp.ge.s32.totalorder %s959_s27, 4   ;;  %s1226_s21 = smov %s881_s22 }
 0x270   : > { %s1227_s22 = smov %s885_s23  ;;  %s1228_s23 = smov %s970_s30 }
 0x271   : > { %s1229_s24 = smov %s959_s27  ;;  %18 = sbr.rel (!%p16_p2) target bundleno = 3 (0x3), region = 79 }
 0x276   :  { %610 = vsyncpa [#allocation3], 1 }
 0x277   :  { %612 = vsyncpa [#allocation3 + $0x1], 1 }

</bundles_post_ra>
